<compile_context>
chip_gen: v6e
topology: v6e:2x2x1
jax: 0.10.0
libtpu: 0.0.40
codegen_flags: <defaults>
</compile_context>

<pallas_src>
import functools

import jax
import jax.numpy as jnp
from jax.experimental import pallas as pl
from jax.experimental.pallas import tpu as pltpu


# ----------------------------------------------------------------------------
# Tiling / VMEM targets.  The operand budget keeps double-buffered tiles well
# under the 32 MiB scoped VMEM that is safe on v5e / v6e / v7x.
# ----------------------------------------------------------------------------
TM_TARGET = 512
VMEM_LIMIT_BYTES = 32 * 1024 * 1024
OPERAND_VMEM_BUDGET = 24 * 1024 * 1024


def _round_up(x, m):
    return (x + m - 1) // m * m


def _largest_divisor_leq(n, cap):
    for d in range(min(cap, n), 0, -1):
        if n % d == 0:
            return d
    return 1


# ----------------------------------------------------------------------------
# Pallas kernels
# ----------------------------------------------------------------------------
def _matmul_bn_leaky_kernel(*refs, has_res):
    """bf16 (patches @ scale-folded weights) on MXU -> +shift -> LeakyReLU(0.1)
    -> optional fused residual add -> bf16 store."""
    if has_res:
        p_ref, w_ref, shift_ref, res_ref, o_ref = refs
    else:
        p_ref, w_ref, shift_ref, o_ref = refs

    acc = jnp.dot(p_ref[...], w_ref[...], preferred_element_type=jnp.float32)
    y = acc + shift_ref[...]                 # BN (scale folded into weights)
    y = jnp.maximum(y, 0.1 * y)              # LeakyReLU(0.1)
    if has_res:
        # weightedFeatureFusion (weight=False, dc == 0): plain residual add.
        y = y + res_ref[...].astype(jnp.float32)
    o_ref[...] = y.astype(o_ref.dtype)


def _conv3x3_s1_kernel(*refs, th, wo, cin, hp, has_res):
    """Fused 3x3 stride-1 conv + BN + LeakyReLU (+ residual) without im2col.

    The padded activation stays in HBM; each grid step DMAs a (th+2)-row halo
    window into VMEM and accumulates the 9 taps with per-row MXU dots.
    """
    if has_res:
        x_hbm, w_ref, shift_ref, res_ref, o_ref, xwin, sem = refs
    else:
        x_hbm, w_ref, shift_ref, o_ref, xwin, sem = refs

    n = pl.program_id(1)                     # image index
    i = pl.program_id(2)                     # output row block
    row0 = n * hp + i * th                   # first padded row of the window
    cp = pltpu.make_async_copy(x_hbm.at[pl.ds(row0, th + 2)], xwin, sem.at[0])
    cp.start()
    cp.wait()

    shift = shift_ref[...]                   # (1, tn) f32
    for r in range(th):                      # static unroll (th <= 8)
        acc = None
        for a in range(3):
            for b in range(3):
                t = a * 3 + b
                xs = xwin[r + a, b:b + wo, :]                 # (wo, cin) bf16
                wt = w_ref[t * cin:(t + 1) * cin, :]          # (cin, tn) bf16
                d = jnp.dot(xs, wt, preferred_element_type=jnp.float32)
                acc = d if acc is None else acc + d
        y = acc + shift
        y = jnp.maximum(y, 0.1 * y)
        if has_res:
            y = y + res_ref[0, r].astype(jnp.float32)
        o_ref[0, r] = y.astype(o_ref.dtype)


def _add_kernel(x_ref, a_ref, o_ref):
    o_ref[...] = x_ref[...] + a_ref[...]


# ----------------------------------------------------------------------------
# Fused matmul wrapper (1x1 convs, stem, stride-2 im2col convs)
# ----------------------------------------------------------------------------
def _fused_conv_matmul(patches, w2, shift, res2=None):
    """(M,K)bf16 @ (K,N)bf16 with fused BN shift / LeakyReLU (+ residual)."""
    M, K = patches.shape
    Kw, N = w2.shape
    assert K == Kw, (K, Kw)

    Mp = _round_up(M, 16)                    # bf16 vregs pack (16,128)
    if Mp != M:                              # only tiny late-stage layers
        patches = jnp.pad(patches, ((0, Mp - M), (0, 0)))
        if res2 is not None:
            res2 = jnp.pad(res2, ((0, Mp - M), (0, 0)))

    tm = min(TM_TARGET, Mp)
    has_res = res2 is not None

    # tn: keep the whole weight matrix resident when the double-buffered
    # operands fit the VMEM budget (weights then DMA'd once per layer).
    cands = [N] + [c for c in (512, 256, 128) if c < N and N % c == 0]
    tn = cands[-1]
    for c in cands:
        est = 2 * (tm * K + K * c + tm * c * (2 if has_res else 1)) * 2 + 2 * c * 4
        if est <= OPERAND_VMEM_BUDGET:
            tn = c
            break
    # Give v7x's two TensorCores >=2 blocks on a parallel axis when the grid
    # would otherwise collapse to a single step.
    if Mp <= tm and tn == N and N >= 256 and N % 256 == 0:
        tn = N // 2

    grid = (pl.cdiv(N, tn), pl.cdiv(Mp, tm))   # weight blocks outermost

    in_specs = [
        pl.BlockSpec((tm, K), lambda j, i: (i, 0)),   # A tile (bf16)
        pl.BlockSpec((K, tn), lambda j, i: (0, j)),   # weights (bf16, resident)
        pl.BlockSpec((1, tn), lambda j, i: (0, j)),   # BN shift (f32)
    ]
    operands = [patches, w2, shift]
    if has_res:
        in_specs.append(pl.BlockSpec((tm, tn), lambda j, i: (i, j)))
        operands.append(res2)

    out = pl.pallas_call(
        functools.partial(_matmul_bn_leaky_kernel, has_res=has_res),
        out_shape=jax.ShapeDtypeStruct((Mp, N), jnp.bfloat16),
        grid_spec=pltpu.PrefetchScalarGridSpec(
            num_scalar_prefetch=0,
            grid=grid,
            in_specs=in_specs,
            out_specs=pl.BlockSpec((tm, tn), lambda j, i: (i, j)),
        ),
        compiler_params=pltpu.CompilerParams(
            dimension_semantics=("parallel", "parallel"),
            vmem_limit_bytes=VMEM_LIMIT_BYTES),
        cost_estimate=pl.CostEstimate(
            flops=2 * Mp * K * N,
            transcendentals=0,
            bytes_accessed=(Mp * K + K * N + Mp * N * (2 if has_res else 1)) * 2),
    )(*operands)
    return out[:M] if Mp != M else out


# ----------------------------------------------------------------------------
# 3x3 stride-1 conv wrapper (no im2col: halo-window DMA in the kernel)
# ----------------------------------------------------------------------------
def _conv3x3_s1(x, w2, shift, residual):
    N, H, W, Cin = x.shape
    Cout = w2.shape[1]
    Ho, Wo = H, W
    Hp, Wp = H + 2, W + 2
    xp = jnp.pad(x, ((0, 0), (1, 1), (1, 1), (0, 0)))      # spatial pad only
    xp = xp.reshape(N * Hp, Wp, Cin)                       # rows flat for DMA

    th = _largest_divisor_leq(Ho, 8)                       # rows per grid step
    has_res = residual is not None
    kp = 9 * Cin

    # tn: whole Cout if the (double-buffered) weight block fits the budget.
    cands = [Cout] + [c for c in (512, 256, 128) if c < Cout and Cout % c == 0]
    tn = cands[-1]
    for c in cands:
        est = (2 * kp * c * 2                               # weights
               + 2 * th * Wo * c * 2                        # output tile
               + (2 * th * Wo * c * 2 if has_res else 0)    # residual tile
               + (th + 2) * Wp * Cin * 2                    # halo window
               + 4 * c * 4)
        if est <= OPERAND_VMEM_BUDGET:
            tn = c
            break

    grid = (Cout // tn, N, Ho // th)                        # weights outermost

    in_specs = [
        pl.BlockSpec(memory_space=pl.ANY),                        # padded x (HBM)
        pl.BlockSpec((kp, tn), lambda j, n, i: (0, j)),           # weights
        pl.BlockSpec((1, tn), lambda j, n, i: (0, j)),            # BN shift
    ]
    operands = [xp, w2, shift]
    if has_res:
        in_specs.append(pl.BlockSpec((1, th, Wo, tn),
                                     lambda j, n, i: (n, i, 0, j)))
        operands.append(residual)

    kern = functools.partial(_conv3x3_s1_kernel, th=th, wo=Wo, cin=Cin,
                             hp=Hp, has_res=has_res)
    out = pl.pallas_call(
        kern,
        out_shape=jax.ShapeDtypeStruct((N, Ho, Wo, Cout), jnp.bfloat16),
        grid_spec=pltpu.PrefetchScalarGridSpec(
            num_scalar_prefetch=0,
            grid=grid,
            in_specs=in_specs,
            out_specs=pl.BlockSpec((1, th, Wo, tn),
                                   lambda j, n, i: (n, i, 0, j)),
            scratch_shapes=[pltpu.VMEM((th + 2, Wp, Cin), jnp.bfloat16),
                            pltpu.SemaphoreType.DMA((1,))],
        ),
        compiler_params=pltpu.CompilerParams(
            dimension_semantics=("parallel", "parallel", "parallel"),
            vmem_limit_bytes=VMEM_LIMIT_BYTES),
        cost_estimate=pl.CostEstimate(
            flops=2 * N * Ho * Wo * kp * Cout,
            transcendentals=0,
            bytes_accessed=(xp.size * 2 + w2.size * 2
                            + N * Ho * Wo * Cout * 2 * (2 if has_res else 1))),
    )(*operands)
    return out


# ----------------------------------------------------------------------------
# Residual-add fallback kernel (unused for darknet53; kept for generality)
# ----------------------------------------------------------------------------
@jax.jit
def _residual_add(x, a):
    # TODO(synk): unequal-channel fusions (dc != 0) and learned fusion weights
    #             are not needed by darknet53.cfg and are not implemented.
    shape = x.shape
    C = shape[-1]
    x2 = x.reshape(-1, C)
    a2 = a.reshape(-1, C)
    R = x2.shape[0]
    Rp = _round_up(R, 16)
    if Rp != R:
        x2 = jnp.pad(x2, ((0, Rp - R), (0, 0)))
        a2 = jnp.pad(a2, ((0, Rp - R), (0, 0)))
    tr = min(1024, Rp)
    out = pl.pallas_call(
        _add_kernel,
        out_shape=jax.ShapeDtypeStruct((Rp, C), x.dtype),
        grid_spec=pltpu.PrefetchScalarGridSpec(
            num_scalar_prefetch=0,
            grid=(pl.cdiv(Rp, tr),),
            in_specs=[pl.BlockSpec((tr, C), lambda i: (i, 0)),
                      pl.BlockSpec((tr, C), lambda i: (i, 0))],
            out_specs=pl.BlockSpec((tr, C), lambda i: (i, 0)),
        ),
        compiler_params=pltpu.CompilerParams(
            dimension_semantics=("parallel",),
            vmem_limit_bytes=VMEM_LIMIT_BYTES),
    )(x2, a2)
    out = out[:R] if Rp != R else out
    return out.reshape(shape)


# ----------------------------------------------------------------------------
# Conv dispatch (patch glue in JAX, hot loops in Pallas)
# ----------------------------------------------------------------------------
def _im2col(x, ksize, stride, pad, k_extra=0):
    """bf16 patches: (N,H,W,C) -> (N*Ho*Wo, k*k*C [+k_extra zero cols]).

    Only used for the stem (Cin=3) and the stride-2 downsample convs; the zero
    block folds the K->multiple-of-8 pad into the single concatenate pass.
    """
    N, H, W, C = x.shape
    xp = jnp.pad(x, ((0, 0), (pad, pad), (pad, pad), (0, 0)))
    Ho = (H + 2 * pad - ksize) // stride + 1
    Wo = (W + 2 * pad - ksize) // stride + 1
    cols = [xp[:, a:a + stride * Ho:stride, b:b + stride * Wo:stride, :]
            for a in range(ksize) for b in range(ksize)]
    if k_extra:
        cols.append(jnp.zeros((N, Ho, Wo, k_extra), x.dtype))
    patches = jnp.concatenate(cols, axis=-1)
    return patches.reshape(N * Ho * Wo, ksize * ksize * C + k_extra), Ho, Wo


@functools.partial(jax.jit, static_argnames=("ksize", "stride"))
def conv_bn_leaky(x, layer_params, residual=None, *, ksize, stride):
    """Conv2d(bias=False, pad=(k-1)//2) + BatchNorm(eval) + LeakyReLU(0.1),
    optionally fused with the residual add of the following shortcut module.

    x: (N, H, W, Cin) bf16 NHWC.  Returns (N, Ho, Wo, Cout) bf16.
    """
    N, H, W, Cin = x.shape
    w2 = layer_params["w2"]
    shift = layer_params["shift"]
    Cout = w2.shape[1]
    pad = (ksize - 1) // 2

    if ksize == 1 and stride == 1:
        # 1x1 conv: feed the MXU straight from the NHWC activation.
        patches = x.reshape(N * H * W, Cin)
        res2 = residual.reshape(N * H * W, Cout) if residual is not None else None
        y = _fused_conv_matmul(patches, w2, shift, res2)
        return y.reshape(N, H, W, Cout)

    if ksize == 3 and stride == 1 and Cin % 8 == 0:
        # All residual-block 3x3 convs: in-kernel halo window, no im2col.
        return _conv3x3_s1(x, w2, shift, residual)

    # Fallback: stem (Cin=3) and stride-2 downsample convs via bf16 im2col.
    patches, Ho, Wo = _im2col(x, ksize, stride, pad,
                              k_extra=w2.shape[0] - ksize * ksize * Cin)
    res2 = residual.reshape(N * Ho * Wo, Cout) if residual is not None else None
    y = _fused_conv_matmul(patches, w2, shift, res2)
    return y.reshape(N, Ho, Wo, Cout)


# ----------------------------------------------------------------------------
# Darknet-53 topology (equivalent to parse_model_cfg('darknet53.cfg'))
# ----------------------------------------------------------------------------
def darknet53_module_defs():
    defs = [dict(type="convolutional", filters=32, size=3, stride=1)]

    def block(filters, nres):
        defs.append(dict(type="convolutional", filters=filters, size=3, stride=2))
        for _ in range(nres):
            defs.append(dict(type="convolutional", filters=filters // 2,
                             size=1, stride=1))
            defs.append(dict(type="convolutional", filters=filters,
                             size=3, stride=1))
            defs.append(dict(type="shortcut", frm=[-3]))

    block(64, 1)
    block(128, 2)
    block(256, 8)
    block(512, 8)
    block(1024, 4)
    return defs


STAGE_LAST_LAYER = [11, 36, 61, 74]   # assumed @stage marker positions
OUT_INDICES = (1, 2, 3)               # default of the PyTorch module


def init_params(module_defs, in_channels=3, seed=0):
    key = jax.random.PRNGKey(seed)
    params = {}
    cin = in_channels
    eps = 1e-5
    for i, mdef in enumerate(module_defs):
        if mdef["type"] != "convolutional":
            continue
        cout, k = mdef["filters"], mdef["size"]
        kk = jax.random.split(jax.random.fold_in(key, i), 5)
        fan_in = cin * k * k
        w = jax.random.normal(kk[0], (cout, cin, k, k), jnp.float32) * \
            jnp.sqrt(2.0 / fan_in)
        gamma = 1.0 + 0.1 * jax.random.normal(kk[1], (cout,), jnp.float32)
        beta = 0.1 * jax.random.normal(kk[2], (cout,), jnp.float32)
        rmean = 0.1 * jax.random.normal(kk[3], (cout,), jnp.float32)
        rvar = 1.0 + 0.1 * jnp.abs(jax.random.normal(kk[4], (cout,), jnp.float32))
        scale = gamma / jnp.sqrt(rvar + eps)            # BN folded (eval mode)
        shift = beta - rmean * scale
        # (Cout, Cin, kh, kw) -> (kh*kw*Cin, Cout): tap-major / channel-minor,
        # matching both the im2col order and the in-kernel 3x3 tap order.
        w2 = jnp.transpose(w, (2, 3, 1, 0)).reshape(k * k * cin, cout)
        w2 = w2 * scale.reshape(1, -1)                  # fold BN scale (f32)
        kp = _round_up(k * k * cin, 8)
        if kp != k * k * cin:                           # stem only (K=27->32)
            w2 = jnp.pad(w2, ((0, kp - k * k * cin), (0, 0)))
        params[i] = dict(w2=w2.astype(jnp.bfloat16),
                         shift=shift.reshape(1, -1))
        cin = cout
    return params


def darknet_forward(x_nchw, params, module_defs):
    out_layer_set = {STAGE_LAST_LAYER[i] for i in OUT_INDICES}
    routs = set()
    for i, mdef in enumerate(module_defs):
        if mdef["type"] == "shortcut":
            routs.update(i + l if l < 0 else l for l in mdef["frm"])

    x = jnp.transpose(x_nchw, (0, 2, 3, 1)).astype(jnp.bfloat16)   # NCHW->NHWC
    outs = []
    saved = []                       # outs_for_shortcut, aligned to module idx
    n_mod = len(module_defs)
    i = 0
    while i < n_mod:
        mdef = module_defs[i]
        if mdef["type"] == "convolutional":
            # Fuse the residual add of an immediately-following shortcut into
            # this conv's epilogue whenever it is safe (always true for
            # darknet53: equal channels, conv output not independently routed
            # or returned).
            residual = None
            fused_shortcut = False
            if (i + 1 < n_mod
                    and module_defs[i + 1]["type"] == "shortcut"
                    and len(module_defs[i + 1]["frm"]) == 1
                    and i not in routs and i not in out_layer_set):
                frm = module_defs[i + 1]["frm"][0]
                src = (i + 1) + frm if frm < 0 else frm
                cand = saved[src]
                if cand is not None and cand.shape[-1] == mdef["filters"]:
                    residual = cand
                    fused_shortcut = True
            x = conv_bn_leaky(x, params[i], residual,
                              ksize=mdef["size"], stride=mdef["stride"])
            saved.append(x if i in routs else None)
            if i in out_layer_set:
                outs.append(x)
            if fused_shortcut:
                j = i + 1                       # the shortcut module's output
                saved.append(x if j in routs else None)
                if j in out_layer_set:
                    outs.append(x)
                i += 2
                continue
        elif mdef["type"] == "shortcut":
            # Unfused fallback (not reached for the darknet53 topology).
            frm = mdef["frm"][0]
            src = i + frm if frm < 0 else frm
            x = _residual_add(x, saved[src])
            saved.append(x if i in routs else None)
            if i in out_layer_set:
                outs.append(x)
        else:
            saved.append(None)
        i += 1

    # Returned stage features back to NCHW f32 (PyTorch convention).
    return tuple(jnp.transpose(o, (0, 3, 1, 2)).astype(jnp.float32)
                 for o in outs)


# ----------------------------------------------------------------------------
if __name__ == "__main__":
    module_defs = darknet53_module_defs()
    params = init_params(module_defs, in_channels=3, seed=0)

    key = jax.random.PRNGKey(0)
    x = jax.random.normal(key, (2, 3, 64, 64), jnp.float32)   # NCHW like PyTorch

    outs = darknet_forward(x, params, module_defs)
    outs = jax.block_until_ready(outs)

    expected = [(2, 256, 8, 8), (2, 512, 4, 4), (2, 1024, 2, 2)]
    got = [tuple(o.shape) for o in outs]
    assert got == expected, f"unexpected output shapes: {got}"
    assert all(bool(jnp.isfinite(o).all()) for o in outs)
    print("KERNEL_OK")
</pallas_src>

<mosaic_0001>
module attributes {stable_mosaic.version = 11 : i64} {
  func.func @_matmul_bn_leaky_kernel(%arg0: i32, %arg1: i32, %arg2: memref<512x32xbf16, #tpu.memory_space<vmem>>, %arg3: memref<32x32xbf16, #tpu.memory_space<vmem>>, %arg4: memref<1x32xf32, #tpu.memory_space<vmem>>, %arg5: memref<512x32xbf16, #tpu.memory_space<vmem>>) attributes {dimension_semantics = [#tpu.dimension_semantics<parallel>, #tpu.dimension_semantics<parallel>], iteration_bounds = array<i64: 1, 16>, scalar_prefetch = 0 : i64, scratch_operands = 0 : i64, tpu.core_type = #tpu.core_type<tc>, window_params = [{transform_indices = @transform_0, window_bounds = array<i64: 512, 32>}, {transform_indices = @transform_1, window_bounds = array<i64: 32, 32>}, {transform_indices = @transform_2, window_bounds = array<i64: 1, 32>}, {transform_indices = @transform_3, window_bounds = array<i64: 512, 32>}]} {
    %c0 = arith.constant 0 : index
    %c0_0 = arith.constant 0 : index
    %0 = vector.load %arg2[%c0, %c0_0] : memref<512x32xbf16, #tpu.memory_space<vmem>>, vector<512x32xbf16>
    %c0_1 = arith.constant 0 : index
    %c0_2 = arith.constant 0 : index
    %1 = vector.load %arg3[%c0_1, %c0_2] : memref<32x32xbf16, #tpu.memory_space<vmem>>, vector<32x32xbf16>
    %cst = arith.constant dense<0.000000e+00> : vector<512x32xf32>
    %2 = tpu.matmul %0, %1, %cst {dimension_numbers = #tpu.dot_dimension_numbers<[1], [0], [0], [1], [0, 0, 1, 1], [], []>} : vector<512x32xbf16>, vector<32x32xbf16>, vector<512x32xf32> -> vector<512x32xf32>
    %c0_3 = arith.constant 0 : index
    %c0_4 = arith.constant 0 : index
    %3 = vector.load %arg4[%c0_3, %c0_4] : memref<1x32xf32, #tpu.memory_space<vmem>>, vector<1x32xf32>
    %4 = vector.broadcast %3 : vector<1x32xf32> to vector<512x32xf32>
    %5 = arith.addf %2, %4 : vector<512x32xf32>
    %cst_5 = arith.constant 1.000000e-01 : f32
    %6 = vector.broadcast %cst_5 : f32 to vector<512x32xf32>
    %7 = arith.mulf %6, %5 : vector<512x32xf32>
    %8 = arith.maximumf %5, %7 : vector<512x32xf32>
    %9 = arith.truncf %8 : vector<512x32xf32> to vector<512x32xbf16>
    %c0_6 = arith.constant 0 : index
    %c0_7 = arith.constant 0 : index
    %10 = vector.load %arg5[%c0_6, %c0_7] : memref<512x32xbf16, #tpu.memory_space<vmem>>, vector<512x32xbf16>
    tpu.vector_store %arg5[%c0_6, %c0_7], %9 {strides = array<i32>} : memref<512x32xbf16, #tpu.memory_space<vmem>>, vector<512x32xbf16>,
    return
  }
  func.func @transform_0(%arg0: i32, %arg1: i32) -> (i32, i32) {
    %c0_i32 = arith.constant 0 : i32
    %c0_i32_0 = arith.constant 0 : i32
    return %arg1, %c0_i32 : i32, i32
  }
  func.func @transform_1(%arg0: i32, %arg1: i32) -> (i32, i32) {
    %c0_i32 = arith.constant 0 : i32
    %c0_i32_0 = arith.constant 0 : i32
    return %c0_i32, %arg0 : i32, i32
  }
  func.func @transform_2(%arg0: i32, %arg1: i32) -> (i32, i32) {
    %c0_i32 = arith.constant 0 : i32
    %c0_i32_0 = arith.constant 0 : i32
    return %c0_i32, %arg0 : i32, i32
  }
  func.func @transform_3(%arg0: i32, %arg1: i32) -> (i32, i32) {
    %c0_i32 = arith.constant 0 : i32
    return %arg1, %arg0 : i32, i32
  }
}

</mosaic_0001>

<bundles_post_ra>
// kernel: conv_bn_leaky.1
= control target key start
LH: loop header
LB: loop body
LE: loop exit
PB: predicated region body
PF: predicated region fallthrough
CT: control target
= control target key end

     0   :  { %s1826_s12 = smov 0   ;;  %s1828_s13 = smov 0   ;;  %s2137_s0 = inlined_call_operand.vmem [shape: bf16[8192,32], index: 0, kind: input, shape index: {}]   ;;  %s2138_s1 = inlined_call_operand.vmem [shape: bf16[32,32], index: 1, kind: input, shape index: {}]   ;;  %s2139_s2 = inlined_call_operand.vmem [shape: f32[1,32], index: 2, kind: input, shape index: {}]   ;;  %s2140_s3 = inlined_call_operand.vmem [shape: bf16[8192,32], index: 3, kind: output, shape index: {}]  }
   0x1   :  { %s1830_s14 = smov 0  }
   0x2 LB: > { %s22_s15 = sadd.s32 1, %s1800_s13  ;;  %p1416_p0 = scmp.ge.s32.totalorder %s1804_s14, 1  ;;  %s1804_s14 = sphi %s1830_s14, %s13_s14   ;;  %s1800_s13 = sphi %s1828_s13, %s2142_s13   ;;  %s1796_s12 = sphi %s1826_s12, %s2141_s12  }
   0x3   : > { %p23_p1 = scmp.ge.s32.totalorder %s22_s15, 16  ;;  %p169_p2 = scmp.lt.s32.totalorder %s1804_s14, 17 }
   0x5   : > { %s2144_s15 = smov (%p23_p1, %s22_s15), 0  ;;  %p170_p3 = pnand %p1416_p0, %p169_p2 }
   0x6   : > { %s1417_s18 = sshll.u32 (!%p170_p3), %s1796_s12, 6 }
   0x7   : > { %173 = sbr.rel (%p170_p3) target bundleno = 286 (0x11e), region = 32  ;;  %p204_p4 = scmp.lt.s32.totalorder (!%p170_p3), %s1417_s18, 1023 }
   0xc   : > { %v1748_v0 = vld [vmem:[%s2138_s1 + $0x8] sm:$0xff]   ;;  %v1749_v1 = vld [vmem:[%s2138_s1] sm:$0xff]   ;;  %s2146_s18 = smov (!%p204_p4, %s1417_s18), 1023  ;;  %vm473_vm0 = vcmask 261120   ;;  %vm1243_vm1 = vcmask 257024  }
   0xd   : > { %1652 = vmatprep.subr.bf16.mxu0 %v1748_v0  ;;  %1720 = vmatprep.subr.bf16.mxu1 %v1748_v0  ;;  %s1418_s21 = sshll.u32 %s2146_s18, 2  ;;  %v1927_v34 = vld [vmem:[%s2139_s2] ss:$0 sm:$0xff] }
   0xe   : > { %1653 = vmatpush3.bf16.msra.mxu0 %v1748_v0  ;;  %1722 = vmatpush3.bf16.msra.mxu1 %v1748_v0  ;;  %s1858_s24 = scalar_lea.vmem %s2137_s0, %s1418_s21  ;;  %s1939_s29 = scalar_lea.vmem %s2140_s3, %s1418_s21 }
   0xf   : > { %1654 = vmatprep.subr.bf16.mxu0 %v1749_v1  ;;  %1721 = vmatprep.subr.bf16.mxu1 %v1749_v1  ;;  %v1750_v2 = vld [vmem:[%s1858_s24] sm:$0xff]   ;;  %v1752_v4 = vld [vmem:[%s1858_s24 + $0x8] sm:$0xff]   ;;  %v1754_v6 = vld [vmem:[%s1858_s24 + $0x10] sm:$0xff]  }
  0x10   : > { %v1751_v3 = vld [vmem:[%s1858_s24 + $0x80] sm:$0xff]   ;;  %1656 = vmatprep.mubr.msk.bf16.mxu0 %vm473_vm0, %v1750_v2  ;;  %v1753_v5 = vld [vmem:[%s1858_s24 + $0x88] sm:$0xff]   ;;  %v1755_v7 = vld [vmem:[%s1858_s24 + $0x90] sm:$0xff]  }
  0x11   : > { %1688 = vmatprep.mubr.msk.bf16.mxu1 %vm473_vm0, %v1751_v3  ;;  %v1756_v8 = vld [vmem:[%s1858_s24 + $0x18] sm:$0xff]   ;;  %v1758_v10 = vld [vmem:[%s1858_s24 + $0x20] sm:$0xff]   ;;  %v1760_v12 = vld [vmem:[%s1858_s24 + $0x28] sm:$0xff]  }
  0x12   : > { %1655 = vmatpush3.bf16.msra.mxu0 %v1749_v1  ;;  %1723 = vmatpush3.bf16.msra.mxu1 %v1749_v1  ;;  %v1757_v9 = vld [vmem:[%s1858_s24 + $0x98] sm:$0xff]   ;;  %v1759_v11 = vld [vmem:[%s1858_s24 + $0xa0] sm:$0xff]   ;;  %v1761_v13 = vld [vmem:[%s1858_s24 + $0xa8] sm:$0xff]  }
  0x13   : > { %v1762_v14 = vld [vmem:[%s1858_s24 + $0x30] sm:$0xff]   ;;  %v1764_v16 = vld [vmem:[%s1858_s24 + $0x38] sm:$0xff]   ;;  %v1766_v18 = vld [vmem:[%s1858_s24 + $0x40] sm:$0xff]  }
  0x14   : > { %v1763_v15 = vld [vmem:[%s1858_s24 + $0xb0] sm:$0xff]   ;;  %v1765_v17 = vld [vmem:[%s1858_s24 + $0xb8] sm:$0xff]   ;;  %v1767_v19 = vld [vmem:[%s1858_s24 + $0xc0] sm:$0xff]  }
  0x15   : > { %1657 = vmatmul.mubr.msk.bf16.vlgmr.msra.gmra.mxu0 %vm473_vm0, %v1752_v4  ;;  %1689 = vmatmul.mubr.msk.bf16.vlgmr.msra.gmra.mxu1 %vm473_vm0, %v1753_v5  ;;  %v1768_v20 = vld [vmem:[%s1858_s24 + $0x48] sm:$0xff]   ;;  %v1770_v22 = vld [vmem:[%s1858_s24 + $0x50] sm:$0xff]   ;;  %v1772_v24 = vld [vmem:[%s1858_s24 + $0x58] sm:$0xff]  }
  0x16   : > { %1660 = vmatprep.mubr.msk.bf16.mxu0 %vm473_vm0, %v1754_v6  ;;  %1692 = vmatprep.mubr.msk.bf16.mxu1 %vm473_vm0, %v1755_v7  ;;  %v1769_v21 = vld [vmem:[%s1858_s24 + $0xc8] sm:$0xff]   ;;  %v1771_v23 = vld [vmem:[%s1858_s24 + $0xd0] sm:$0xff]   ;;  %v1773_v25 = vld [vmem:[%s1858_s24 + $0xd8] sm:$0xff]  }
  0x17   : > { %v1774_v26 = vld [vmem:[%s1858_s24 + $0x60] sm:$0xff]   ;;  %v1776_v28 = vld [vmem:[%s1858_s24 + $0x68] sm:$0xff]   ;;  %v1778_v30 = vld [vmem:[%s1858_s24 + $0x70] sm:$0xff]  }
  0x18   : > { %v1775_v27 = vld [vmem:[%s1858_s24 + $0xe0] sm:$0xff]   ;;  %v1777_v29 = vld [vmem:[%s1858_s24 + $0xe8] sm:$0xff]   ;;  %v1779_v31 = vld [vmem:[%s1858_s24 + $0xf0] sm:$0xff]  }
  0x19   : > { %v1780_v32 = vld [vmem:[%s1858_s24 + $0x78] sm:$0xff]  }
  0x1a   : > { %v1781_v33 = vld [vmem:[%s1858_s24 + $0xf8] sm:$0xff]  }
  0x1d   : > { %1661 = vmatmul.mubr.msk.bf16.gmra.mxu0 %vm473_vm0, %v1756_v8  ;;  %1693 = vmatmul.mubr.msk.bf16.gmra.mxu1 %vm473_vm0, %v1757_v9 }
  0x1e   : > { %1664 = vmatprep.mubr.msk.bf16.mxu0 %vm473_vm0, %v1758_v10  ;;  %1696 = vmatprep.mubr.msk.bf16.mxu1 %vm473_vm0, %v1759_v11 }
  0x25   : > { %1665 = vmatmul.mubr.msk.bf16.gmra.mxu0 %vm473_vm0, %v1760_v12  ;;  %1697 = vmatmul.mubr.msk.bf16.gmra.mxu1 %vm473_vm0, %v1761_v13 }
  0x26   : > { %1668 = vmatprep.mubr.msk.bf16.mxu0 %vm473_vm0, %v1762_v14  ;;  %1700 = vmatprep.mubr.msk.bf16.mxu1 %vm473_vm0, %v1763_v15 }
  0x2d   : > { %1669 = vmatmul.mubr.msk.bf16.gmra.mxu0 %vm473_vm0, %v1764_v16  ;;  %1701 = vmatmul.mubr.msk.bf16.gmra.mxu1 %vm473_vm0, %v1765_v17 }
  0x2e   : > { %1672 = vmatprep.mubr.msk.bf16.mxu0 %vm473_vm0, %v1766_v18  ;;  %1704 = vmatprep.mubr.msk.bf16.mxu1 %vm473_vm0, %v1767_v19 }
  0x35   : > { %1673 = vmatmul.mubr.msk.bf16.gmra.mxu0 %vm473_vm0, %v1768_v20  ;;  %1705 = vmatmul.mubr.msk.bf16.gmra.mxu1 %vm473_vm0, %v1769_v21 }
  0x36   : > { %1676 = vmatprep.mubr.msk.bf16.mxu0 %vm473_vm0, %v1770_v22  ;;  %1708 = vmatprep.mubr.msk.bf16.mxu1 %vm473_vm0, %v1771_v23 }
  0x3d   : > { %1677 = vmatmul.mubr.msk.bf16.gmra.mxu0 %vm473_vm0, %v1772_v24  ;;  %1709 = vmatmul.mubr.msk.bf16.gmra.mxu1 %vm473_vm0, %v1773_v25 }
  0x3e   : > { %1680 = vmatprep.mubr.msk.bf16.mxu0 %vm473_vm0, %v1774_v26  ;;  %1712 = vmatprep.mubr.msk.bf16.mxu1 %vm473_vm0, %v1775_v27 }
  0x45   : > { %1681 = vmatmul.mubr.msk.bf16.gmra.mxu0 %vm473_vm0, %v1776_v28  ;;  %1713 = vmatmul.mubr.msk.bf16.gmra.mxu1 %vm473_vm0, %v1777_v29 }
  0x46   : > { %1684 = vmatprep.mubr.msk.bf16.mxu0 %vm473_vm0, %v1778_v30  ;;  %1716 = vmatprep.mubr.msk.bf16.mxu1 %vm473_vm0, %v1779_v31 }
  0x4d   : > { %1685 = vmatmul.mubr.msk.bf16.gmra.mxu0 %vm473_vm0, %v1780_v32  ;;  %1717 = vmatmul.mubr.msk.bf16.gmra.mxu1 %vm473_vm0, %v1781_v33 }
  0xd5   : > { %v1658_v35 = vpop.f32.mrf.mxu0  ;;  %v1690_v37 = vpop.f32.mrf.mxu1 }
  0xd6   : > { %v613_v36 = vadd.f32 %v1658_v35, %v1927_v34  ;;  %v741_v38 = vadd.f32 %v1690_v37, %v1927_v34 }
  0xd7   : > { %v604_v39 = vpop.f32.mrf.mxu0  ;;  %v732_v42 = vpop.f32.mrf.mxu1 }
  0xd8   : > { %v861_v40 = vmul.f32 0.1, %v613_v36  ;;  %v605_v41 = vadd.f32 %v1927_v34, %v604_v39  ;;  %v893_v43 = vmul.f32 0.1, %v741_v38  ;;  %v733_v44 = vadd.f32 %v1927_v34, %v732_v42 }
  0xd9   : > { %v1659_v45 = vpop.f32.mrf.mxu0  ;;  %v1691_v49 = vpop.f32.mrf.mxu1 }
  0xda   : > { %v925_v46 = vmax.f32 %v613_v36, %v861_v40  ;;  %v859_v47 = vmul.f32 0.1, %v605_v41  ;;  %v616_v48 = vadd.f32 %v1659_v45, %v1927_v34  ;;  %v957_v50 = vmax.f32 %v741_v38, %v893_v43 }
  0xdb   : > { %v891_v51 = vmul.f32 0.1, %v733_v44  ;;  %v744_v52 = vadd.f32 %v1691_v49, %v1927_v34  ;;  %v607_v53 = vpop.f32.mrf.mxu0  ;;  %v735_v58 = vpop.f32.mrf.mxu1 }
  0xdc   : > { %v1556_v54 = vpack.c.bf16 %v925_v46, %v925_v46  ;;  %v923_v55 = vmax.f32 %v605_v41, %v859_v47  ;;  %v862_v56 = vmul.f32 0.1, %v616_v48  ;;  %v608_v57 = vadd.f32 %v1927_v34, %v607_v53 }
  0xdd   : > { %v1588_v59 = vpack.c.bf16 %v957_v50, %v957_v50  ;;  %v955_v60 = vmax.f32 %v733_v44, %v891_v51  ;;  %v894_v61 = vmul.f32 0.1, %v744_v52  ;;  %v736_v62 = vadd.f32 %v1927_v34, %v735_v58  ;;  %v1662_v63 = vpop.f32.mrf.mxu0  ;;  %v1694_v4 = vpop.f32.mrf.mxu1 }
  0xde   : > { %1246 = vst.msk [vmem:[%s1939_s29 + $0x8] sm:$0xf] %vm1243_vm1, %v1556_v54  ;;  %v1554_v0 = vpack.c.bf16 %v923_v55, %v923_v55  ;;  %v926_v1 = vmax.f32 %v616_v48, %v862_v56  ;;  %v860_v2 = vmul.f32 0.1, %v608_v57  ;;  %v629_v3 = vadd.f32 %v1662_v63, %v1927_v34 }
  0xdf   : > { %1278 = vst.msk [vmem:[%s1939_s29 + $0x88] sm:$0xf] %vm1243_vm1, %v1588_v59  ;;  %v1586_v5 = vpack.c.bf16 %v955_v60, %v955_v60  ;;  %v958_v6 = vmax.f32 %v744_v52, %v894_v61  ;;  %v892_v7 = vmul.f32 0.1, %v736_v62  ;;  %v757_v8 = vadd.f32 %v1694_v4, %v1927_v34  ;;  %v620_v9 = vpop.f32.mrf.mxu0  ;;  %v748_v14 = vpop.f32.mrf.mxu1 }
  0xe0   : > { %1244 = vst.msk [vmem:[%s1939_s29] sm:$0xf] %vm1243_vm1, %v1554_v0  ;;  %v1557_v10 = vpack.c.bf16 %v926_v1, %v926_v1  ;;  %v924_v11 = vmax.f32 %v608_v57, %v860_v2  ;;  %v865_v12 = vmul.f32 0.1, %v629_v3  ;;  %v621_v13 = vadd.f32 %v1927_v34, %v620_v9 }
  0xe1   : > { %1276 = vst.msk [vmem:[%s1939_s29 + $0x80] sm:$0xf] %vm1243_vm1, %v1586_v5  ;;  %v1589_v15 = vpack.c.bf16 %v958_v6, %v958_v6  ;;  %v956_v16 = vmax.f32 %v736_v62, %v892_v7  ;;  %v897_v17 = vmul.f32 0.1, %v757_v8  ;;  %v749_v18 = vadd.f32 %v1927_v34, %v748_v14  ;;  %v1663_v19 = vpop.f32.mrf.mxu0  ;;  %v1695_v24 = vpop.f32.mrf.mxu1 }
  0xe2   : > { %1247 = vst.msk [vmem:[%s1939_s29 + $0xc] sm:$0xf] %vm1243_vm1, %v1557_v10  ;;  %v1555_v20 = vpack.c.bf16 %v924_v11, %v924_v11  ;;  %v929_v21 = vmax.f32 %v629_v3, %v865_v12  ;;  %v863_v22 = vmul.f32 0.1, %v621_v13  ;;  %v632_v23 = vadd.f32 %v1663_v19, %v1927_v34 }
  0xe3   : > { %1279 = vst.msk [vmem:[%s1939_s29 + $0x8c] sm:$0xf] %vm1243_vm1, %v1589_v15  ;;  %v1587_v25 = vpack.c.bf16 %v956_v16, %v956_v16  ;;  %v961_v26 = vmax.f32 %v757_v8, %v897_v17  ;;  %v895_v27 = vmul.f32 0.1, %v749_v18  ;;  %v760_v28 = vadd.f32 %v1695_v24, %v1927_v34  ;;  %v623_v29 = vpop.f32.mrf.mxu0  ;;  %v751_v35 = vpop.f32.mrf.mxu1 }
  0xe4   : > { %1245 = vst.msk [vmem:[%s1939_s29 + $0x4] sm:$0xf] %vm1243_vm1, %v1555_v20  ;;  %v1560_v30 = vpack.c.bf16 %v929_v21, %v929_v21  ;;  %v927_v31 = vmax.f32 %v621_v13, %v863_v22  ;;  %v866_v32 = vmul.f32 0.1, %v632_v23  ;;  %v624_v33 = vadd.f32 %v1927_v34, %v623_v29 }
  0xe5   : > { %1277 = vst.msk [vmem:[%s1939_s29 + $0x84] sm:$0xf] %vm1243_vm1, %v1587_v25  ;;  %v1592_v36 = vpack.c.bf16 %v961_v26, %v961_v26  ;;  %v959_v37 = vmax.f32 %v749_v18, %v895_v27  ;;  %v898_v38 = vmul.f32 0.1, %v760_v28  ;;  %v752_v39 = vadd.f32 %v1927_v34, %v751_v35  ;;  %v1666_v40 = vpop.f32.mrf.mxu0  ;;  %v1698_v45 = vpop.f32.mrf.mxu1 }
  0xe6   : > { %1250 = vst.msk [vmem:[%s1939_s29 + $0x18] sm:$0xf] %vm1243_vm1, %v1560_v30  ;;  %v1558_v41 = vpack.c.bf16 %v927_v31, %v927_v31  ;;  %v930_v42 = vmax.f32 %v632_v23, %v866_v32  ;;  %v864_v43 = vmul.f32 0.1, %v624_v33  ;;  %v645_v44 = vadd.f32 %v1666_v40, %v1927_v34 }
  0xe7   : > { %1282 = vst.msk [vmem:[%s1939_s29 + $0x98] sm:$0xf] %vm1243_vm1, %v1592_v36  ;;  %v1590_v46 = vpack.c.bf16 %v959_v37, %v959_v37  ;;  %v962_v47 = vmax.f32 %v760_v28, %v898_v38  ;;  %v896_v48 = vmul.f32 0.1, %v752_v39  ;;  %v773_v49 = vadd.f32 %v1698_v45, %v1927_v34  ;;  %v636_v50 = vpop.f32.mrf.mxu0  ;;  %v764_v55 = vpop.f32.mrf.mxu1 }
  0xe8   : > { %1248 = vst.msk [vmem:[%s1939_s29 + $0x10] sm:$0xf] %vm1243_vm1, %v1558_v41  ;;  %v1561_v51 = vpack.c.bf16 %v930_v42, %v930_v42  ;;  %v928_v52 = vmax.f32 %v624_v33, %v864_v43  ;;  %v869_v53 = vmul.f32 0.1, %v645_v44  ;;  %v637_v54 = vadd.f32 %v1927_v34, %v636_v50 }
  0xe9   : > { %1280 = vst.msk [vmem:[%s1939_s29 + $0x90] sm:$0xf] %vm1243_vm1, %v1590_v46  ;;  %v1593_v56 = vpack.c.bf16 %v962_v47, %v962_v47  ;;  %v960_v57 = vmax.f32 %v752_v39, %v896_v48  ;;  %v901_v58 = vmul.f32 0.1, %v773_v49  ;;  %v765_v59 = vadd.f32 %v1927_v34, %v764_v55  ;;  %v1667_v60 = vpop.f32.mrf.mxu0  ;;  %v1699_v1 = vpop.f32.mrf.mxu1 }
  0xea   : > { %1251 = vst.msk [vmem:[%s1939_s29 + $0x1c] sm:$0xf] %vm1243_vm1, %v1561_v51  ;;  %v1559_v61 = vpack.c.bf16 %v928_v52, %v928_v52  ;;  %v933_v62 = vmax.f32 %v645_v44, %v869_v53  ;;  %v867_v63 = vmul.f32 0.1, %v637_v54  ;;  %v648_v0 = vadd.f32 %v1667_v60, %v1927_v34 }
  0xeb   : > { %1283 = vst.msk [vmem:[%s1939_s29 + $0x9c] sm:$0xf] %vm1243_vm1, %v1593_v56  ;;  %v1591_v2 = vpack.c.bf16 %v960_v57, %v960_v57  ;;  %v965_v3 = vmax.f32 %v773_v49, %v901_v58  ;;  %v899_v4 = vmul.f32 0.1, %v765_v59  ;;  %v776_v5 = vadd.f32 %v1699_v1, %v1927_v34  ;;  %v639_v6 = vpop.f32.mrf.mxu0  ;;  %v767_v11 = vpop.f32.mrf.mxu1 }
  0xec   : > { %1249 = vst.msk [vmem:[%s1939_s29 + $0x14] sm:$0xf] %vm1243_vm1, %v1559_v61  ;;  %v1564_v7 = vpack.c.bf16 %v933_v62, %v933_v62  ;;  %v931_v8 = vmax.f32 %v637_v54, %v867_v63  ;;  %v870_v9 = vmul.f32 0.1, %v648_v0  ;;  %v640_v10 = vadd.f32 %v1927_v34, %v639_v6 }
  0xed   : > { %1281 = vst.msk [vmem:[%s1939_s29 + $0x94] sm:$0xf] %vm1243_vm1, %v1591_v2  ;;  %v1596_v12 = vpack.c.bf16 %v965_v3, %v965_v3  ;;  %v963_v13 = vmax.f32 %v765_v59, %v899_v4  ;;  %v902_v14 = vmul.f32 0.1, %v776_v5  ;;  %v768_v15 = vadd.f32 %v1927_v34, %v767_v11  ;;  %v1670_v16 = vpop.f32.mrf.mxu0  ;;  %v1702_v21 = vpop.f32.mrf.mxu1 }
  0xee   : > { %1254 = vst.msk [vmem:[%s1939_s29 + $0x28] sm:$0xf] %vm1243_vm1, %v1564_v7  ;;  %v1562_v17 = vpack.c.bf16 %v931_v8, %v931_v8  ;;  %v934_v18 = vmax.f32 %v648_v0, %v870_v9  ;;  %v868_v19 = vmul.f32 0.1, %v640_v10  ;;  %v661_v20 = vadd.f32 %v1670_v16, %v1927_v34 }
  0xef   : > { %1286 = vst.msk [vmem:[%s1939_s29 + $0xa8] sm:$0xf] %vm1243_vm1, %v1596_v12  ;;  %v1594_v22 = vpack.c.bf16 %v963_v13, %v963_v13  ;;  %v966_v23 = vmax.f32 %v776_v5, %v902_v14  ;;  %v900_v24 = vmul.f32 0.1, %v768_v15  ;;  %v789_v25 = vadd.f32 %v1702_v21, %v1927_v34  ;;  %v652_v26 = vpop.f32.mrf.mxu0  ;;  %v780_v31 = vpop.f32.mrf.mxu1 }
  0xf0   : > { %1252 = vst.msk [vmem:[%s1939_s29 + $0x20] sm:$0xf] %vm1243_vm1, %v1562_v17  ;;  %v1565_v27 = vpack.c.bf16 %v934_v18, %v934_v18  ;;  %v932_v28 = vmax.f32 %v640_v10, %v868_v19  ;;  %v873_v29 = vmul.f32 0.1, %v661_v20  ;;  %v653_v30 = vadd.f32 %v1927_v34, %v652_v26 }
  0xf1   : > { %1284 = vst.msk [vmem:[%s1939_s29 + $0xa0] sm:$0xf] %vm1243_vm1, %v1594_v22  ;;  %v1597_v32 = vpack.c.bf16 %v966_v23, %v966_v23  ;;  %v964_v33 = vmax.f32 %v768_v15, %v900_v24  ;;  %v905_v35 = vmul.f32 0.1, %v789_v25  ;;  %v781_v36 = vadd.f32 %v1927_v34, %v780_v31  ;;  %v1671_v37 = vpop.f32.mrf.mxu0  ;;  %v1703_v42 = vpop.f32.mrf.mxu1 }
  0xf2   : > { %1255 = vst.msk [vmem:[%s1939_s29 + $0x2c] sm:$0xf] %vm1243_vm1, %v1565_v27  ;;  %v1563_v38 = vpack.c.bf16 %v932_v28, %v932_v28  ;;  %v937_v39 = vmax.f32 %v661_v20, %v873_v29  ;;  %v871_v40 = vmul.f32 0.1, %v653_v30  ;;  %v664_v41 = vadd.f32 %v1671_v37, %v1927_v34 }
  0xf3   : > { %1287 = vst.msk [vmem:[%s1939_s29 + $0xac] sm:$0xf] %vm1243_vm1, %v1597_v32  ;;  %v1595_v43 = vpack.c.bf16 %v964_v33, %v964_v33  ;;  %v969_v44 = vmax.f32 %v789_v25, %v905_v35  ;;  %v903_v45 = vmul.f32 0.1, %v781_v36  ;;  %v792_v46 = vadd.f32 %v1703_v42, %v1927_v34  ;;  %v655_v47 = vpop.f32.mrf.mxu0  ;;  %v783_v52 = vpop.f32.mrf.mxu1 }
  0xf4   : > { %1253 = vst.msk [vmem:[%s1939_s29 + $0x24] sm:$0xf] %vm1243_vm1, %v1563_v38  ;;  %v1568_v48 = vpack.c.bf16 %v937_v39, %v937_v39  ;;  %v935_v49 = vmax.f32 %v653_v30, %v871_v40  ;;  %v874_v50 = vmul.f32 0.1, %v664_v41  ;;  %v656_v51 = vadd.f32 %v1927_v34, %v655_v47 }
  0xf5   : > { %1285 = vst.msk [vmem:[%s1939_s29 + $0xa4] sm:$0xf] %vm1243_vm1, %v1595_v43  ;;  %v1600_v53 = vpack.c.bf16 %v969_v44, %v969_v44  ;;  %v967_v54 = vmax.f32 %v781_v36, %v903_v45  ;;  %v906_v55 = vmul.f32 0.1, %v792_v46  ;;  %v784_v56 = vadd.f32 %v1927_v34, %v783_v52  ;;  %v1674_v57 = vpop.f32.mrf.mxu0  ;;  %v1706_v62 = vpop.f32.mrf.mxu1 }
  0xf6   : > { %1258 = vst.msk [vmem:[%s1939_s29 + $0x38] sm:$0xf] %vm1243_vm1, %v1568_v48  ;;  %v1566_v58 = vpack.c.bf16 %v935_v49, %v935_v49  ;;  %v938_v59 = vmax.f32 %v664_v41, %v874_v50  ;;  %v872_v60 = vmul.f32 0.1, %v656_v51  ;;  %v677_v61 = vadd.f32 %v1674_v57, %v1927_v34 }
  0xf7   : > { %1290 = vst.msk [vmem:[%s1939_s29 + $0xb8] sm:$0xf] %vm1243_vm1, %v1600_v53  ;;  %v1598_v63 = vpack.c.bf16 %v967_v54, %v967_v54  ;;  %v970_v0 = vmax.f32 %v792_v46, %v906_v55  ;;  %v904_v1 = vmul.f32 0.1, %v784_v56  ;;  %v805_v2 = vadd.f32 %v1706_v62, %v1927_v34  ;;  %v668_v3 = vpop.f32.mrf.mxu0  ;;  %v796_v8 = vpop.f32.mrf.mxu1 }
  0xf8   : > { %1256 = vst.msk [vmem:[%s1939_s29 + $0x30] sm:$0xf] %vm1243_vm1, %v1566_v58  ;;  %v1569_v4 = vpack.c.bf16 %v938_v59, %v938_v59  ;;  %v936_v5 = vmax.f32 %v656_v51, %v872_v60  ;;  %v877_v6 = vmul.f32 0.1, %v677_v61  ;;  %v669_v7 = vadd.f32 %v1927_v34, %v668_v3 }
  0xf9   : > { %1288 = vst.msk [vmem:[%s1939_s29 + $0xb0] sm:$0xf] %vm1243_vm1, %v1598_v63  ;;  %v1601_v9 = vpack.c.bf16 %v970_v0, %v970_v0  ;;  %v968_v10 = vmax.f32 %v784_v56, %v904_v1  ;;  %v909_v11 = vmul.f32 0.1, %v805_v2  ;;  %v797_v12 = vadd.f32 %v1927_v34, %v796_v8  ;;  %v1675_v13 = vpop.f32.mrf.mxu0  ;;  %v1707_v18 = vpop.f32.mrf.mxu1 }
  0xfa   : > { %1259 = vst.msk [vmem:[%s1939_s29 + $0x3c] sm:$0xf] %vm1243_vm1, %v1569_v4  ;;  %v1567_v14 = vpack.c.bf16 %v936_v5, %v936_v5  ;;  %v941_v15 = vmax.f32 %v677_v61, %v877_v6  ;;  %v875_v16 = vmul.f32 0.1, %v669_v7  ;;  %v680_v17 = vadd.f32 %v1675_v13, %v1927_v34 }
  0xfb   : > { %1291 = vst.msk [vmem:[%s1939_s29 + $0xbc] sm:$0xf] %vm1243_vm1, %v1601_v9  ;;  %v1599_v19 = vpack.c.bf16 %v968_v10, %v968_v10  ;;  %v973_v20 = vmax.f32 %v805_v2, %v909_v11  ;;  %v907_v21 = vmul.f32 0.1, %v797_v12  ;;  %v808_v22 = vadd.f32 %v1707_v18, %v1927_v34  ;;  %v671_v23 = vpop.f32.mrf.mxu0  ;;  %v799_v28 = vpop.f32.mrf.mxu1 }
  0xfc   : > { %1257 = vst.msk [vmem:[%s1939_s29 + $0x34] sm:$0xf] %vm1243_vm1, %v1567_v14  ;;  %v1572_v24 = vpack.c.bf16 %v941_v15, %v941_v15  ;;  %v939_v25 = vmax.f32 %v669_v7, %v875_v16  ;;  %v878_v26 = vmul.f32 0.1, %v680_v17  ;;  %v672_v27 = vadd.f32 %v1927_v34, %v671_v23 }
  0xfd   : > { %1289 = vst.msk [vmem:[%s1939_s29 + $0xb4] sm:$0xf] %vm1243_vm1, %v1599_v19  ;;  %v1604_v29 = vpack.c.bf16 %v973_v20, %v973_v20  ;;  %v971_v30 = vmax.f32 %v797_v12, %v907_v21  ;;  %v910_v31 = vmul.f32 0.1, %v808_v22  ;;  %v800_v32 = vadd.f32 %v1927_v34, %v799_v28  ;;  %v1678_v33 = vpop.f32.mrf.mxu0  ;;  %v1710_v39 = vpop.f32.mrf.mxu1 }
  0xfe   : > { %1262 = vst.msk [vmem:[%s1939_s29 + $0x48] sm:$0xf] %vm1243_vm1, %v1572_v24  ;;  %v1570_v35 = vpack.c.bf16 %v939_v25, %v939_v25  ;;  %v942_v36 = vmax.f32 %v680_v17, %v878_v26  ;;  %v876_v37 = vmul.f32 0.1, %v672_v27  ;;  %v693_v38 = vadd.f32 %v1678_v33, %v1927_v34 }
  0xff   : > { %1294 = vst.msk [vmem:[%s1939_s29 + $0xc8] sm:$0xf] %vm1243_vm1, %v1604_v29  ;;  %v1602_v40 = vpack.c.bf16 %v971_v30, %v971_v30  ;;  %v974_v41 = vmax.f32 %v808_v22, %v910_v31  ;;  %v908_v42 = vmul.f32 0.1, %v800_v32  ;;  %v821_v43 = vadd.f32 %v1710_v39, %v1927_v34  ;;  %v684_v44 = vpop.f32.mrf.mxu0  ;;  %v812_v49 = vpop.f32.mrf.mxu1 }
 0x100   : > { %1260 = vst.msk [vmem:[%s1939_s29 + $0x40] sm:$0xf] %vm1243_vm1, %v1570_v35  ;;  %v1573_v45 = vpack.c.bf16 %v942_v36, %v942_v36  ;;  %v940_v46 = vmax.f32 %v672_v27, %v876_v37  ;;  %v881_v47 = vmul.f32 0.1, %v693_v38  ;;  %v685_v48 = vadd.f32 %v1927_v34, %v684_v44 }
 0x101   : > { %1292 = vst.msk [vmem:[%s1939_s29 + $0xc0] sm:$0xf] %vm1243_vm1, %v1602_v40  ;;  %v1605_v50 = vpack.c.bf16 %v974_v41, %v974_v41  ;;  %v972_v51 = vmax.f32 %v800_v32, %v908_v42  ;;  %v913_v52 = vmul.f32 0.1, %v821_v43  ;;  %v813_v53 = vadd.f32 %v1927_v34, %v812_v49  ;;  %v1679_v54 = vpop.f32.mrf.mxu0  ;;  %v1711_v59 = vpop.f32.mrf.mxu1 }
 0x102   : > { %1263 = vst.msk [vmem:[%s1939_s29 + $0x4c] sm:$0xf] %vm1243_vm1, %v1573_v45  ;;  %v1571_v55 = vpack.c.bf16 %v940_v46, %v940_v46  ;;  %v945_v56 = vmax.f32 %v693_v38, %v881_v47  ;;  %v879_v57 = vmul.f32 0.1, %v685_v48  ;;  %v696_v58 = vadd.f32 %v1679_v54, %v1927_v34 }
 0x103   : > { %1295 = vst.msk [vmem:[%s1939_s29 + $0xcc] sm:$0xf] %vm1243_vm1, %v1605_v50  ;;  %v1603_v60 = vpack.c.bf16 %v972_v51, %v972_v51  ;;  %v977_v61 = vmax.f32 %v821_v43, %v913_v52  ;;  %v911_v62 = vmul.f32 0.1, %v813_v53  ;;  %v824_v63 = vadd.f32 %v1711_v59, %v1927_v34  ;;  %v687_v0 = vpop.f32.mrf.mxu0  ;;  %v815_v5 = vpop.f32.mrf.mxu1 }
 0x104   : > { %1261 = vst.msk [vmem:[%s1939_s29 + $0x44] sm:$0xf] %vm1243_vm1, %v1571_v55  ;;  %v1576_v1 = vpack.c.bf16 %v945_v56, %v945_v56  ;;  %v943_v2 = vmax.f32 %v685_v48, %v879_v57  ;;  %v882_v3 = vmul.f32 0.1, %v696_v58  ;;  %v688_v4 = vadd.f32 %v1927_v34, %v687_v0 }
 0x105   : > { %1293 = vst.msk [vmem:[%s1939_s29 + $0xc4] sm:$0xf] %vm1243_vm1, %v1603_v60  ;;  %v1608_v6 = vpack.c.bf16 %v977_v61, %v977_v61  ;;  %v975_v7 = vmax.f32 %v813_v53, %v911_v62  ;;  %v914_v8 = vmul.f32 0.1, %v824_v63  ;;  %v816_v9 = vadd.f32 %v1927_v34, %v815_v5  ;;  %v1682_v10 = vpop.f32.mrf.mxu0  ;;  %v1714_v15 = vpop.f32.mrf.mxu1 }
 0x106   : > { %1266 = vst.msk [vmem:[%s1939_s29 + $0x58] sm:$0xf] %vm1243_vm1, %v1576_v1  ;;  %v1574_v11 = vpack.c.bf16 %v943_v2, %v943_v2  ;;  %v946_v12 = vmax.f32 %v696_v58, %v882_v3  ;;  %v880_v13 = vmul.f32 0.1, %v688_v4  ;;  %v709_v14 = vadd.f32 %v1682_v10, %v1927_v34 }
 0x107   : > { %1298 = vst.msk [vmem:[%s1939_s29 + $0xd8] sm:$0xf] %vm1243_vm1, %v1608_v6  ;;  %v1606_v16 = vpack.c.bf16 %v975_v7, %v975_v7  ;;  %v978_v17 = vmax.f32 %v824_v63, %v914_v8  ;;  %v912_v18 = vmul.f32 0.1, %v816_v9  ;;  %v837_v19 = vadd.f32 %v1714_v15, %v1927_v34  ;;  %v700_v20 = vpop.f32.mrf.mxu0  ;;  %v828_v25 = vpop.f32.mrf.mxu1 }
 0x108   : > { %1264 = vst.msk [vmem:[%s1939_s29 + $0x50] sm:$0xf] %vm1243_vm1, %v1574_v11  ;;  %v1577_v21 = vpack.c.bf16 %v946_v12, %v946_v12  ;;  %v944_v22 = vmax.f32 %v688_v4, %v880_v13  ;;  %v885_v23 = vmul.f32 0.1, %v709_v14  ;;  %v701_v24 = vadd.f32 %v1927_v34, %v700_v20 }
 0x109   : > { %1296 = vst.msk [vmem:[%s1939_s29 + $0xd0] sm:$0xf] %vm1243_vm1, %v1606_v16  ;;  %v1609_v26 = vpack.c.bf16 %v978_v17, %v978_v17  ;;  %v976_v27 = vmax.f32 %v816_v9, %v912_v18  ;;  %v917_v28 = vmul.f32 0.1, %v837_v19  ;;  %v829_v29 = vadd.f32 %v1927_v34, %v828_v25  ;;  %v1683_v30 = vpop.f32.mrf.mxu0  ;;  %v1715_v36 = vpop.f32.mrf.mxu1 }
 0x10a   : > { %1267 = vst.msk [vmem:[%s1939_s29 + $0x5c] sm:$0xf] %vm1243_vm1, %v1577_v21  ;;  %v1575_v31 = vpack.c.bf16 %v944_v22, %v944_v22  ;;  %v949_v32 = vmax.f32 %v709_v14, %v885_v23  ;;  %v883_v33 = vmul.f32 0.1, %v701_v24  ;;  %v712_v35 = vadd.f32 %v1683_v30, %v1927_v34 }
 0x10b   : > { %1299 = vst.msk [vmem:[%s1939_s29 + $0xdc] sm:$0xf] %vm1243_vm1, %v1609_v26  ;;  %v1607_v37 = vpack.c.bf16 %v976_v27, %v976_v27  ;;  %v981_v38 = vmax.f32 %v837_v19, %v917_v28  ;;  %v915_v39 = vmul.f32 0.1, %v829_v29  ;;  %v840_v40 = vadd.f32 %v1715_v36, %v1927_v34  ;;  %v703_v41 = vpop.f32.mrf.mxu0  ;;  %v831_v46 = vpop.f32.mrf.mxu1 }
 0x10c   : > { %1265 = vst.msk [vmem:[%s1939_s29 + $0x54] sm:$0xf] %vm1243_vm1, %v1575_v31  ;;  %v1580_v42 = vpack.c.bf16 %v949_v32, %v949_v32  ;;  %v947_v43 = vmax.f32 %v701_v24, %v883_v33  ;;  %v886_v44 = vmul.f32 0.1, %v712_v35  ;;  %v704_v45 = vadd.f32 %v1927_v34, %v703_v41 }
 0x10d   : > { %1297 = vst.msk [vmem:[%s1939_s29 + $0xd4] sm:$0xf] %vm1243_vm1, %v1607_v37  ;;  %v1612_v47 = vpack.c.bf16 %v981_v38, %v981_v38  ;;  %v979_v48 = vmax.f32 %v829_v29, %v915_v39  ;;  %v918_v49 = vmul.f32 0.1, %v840_v40  ;;  %v832_v50 = vadd.f32 %v1927_v34, %v831_v46  ;;  %v1686_v51 = vpop.f32.mrf.mxu0  ;;  %v1718_v56 = vpop.f32.mrf.mxu1 }
 0x10e   : > { %1270 = vst.msk [vmem:[%s1939_s29 + $0x68] sm:$0xf] %vm1243_vm1, %v1580_v42  ;;  %v1578_v52 = vpack.c.bf16 %v947_v43, %v947_v43  ;;  %v950_v53 = vmax.f32 %v712_v35, %v886_v44  ;;  %v884_v54 = vmul.f32 0.1, %v704_v45  ;;  %v725_v55 = vadd.f32 %v1686_v51, %v1927_v34 }
 0x10f   : > { %1302 = vst.msk [vmem:[%s1939_s29 + $0xe8] sm:$0xf] %vm1243_vm1, %v1612_v47  ;;  %v1610_v57 = vpack.c.bf16 %v979_v48, %v979_v48  ;;  %v982_v58 = vmax.f32 %v840_v40, %v918_v49  ;;  %v916_v59 = vmul.f32 0.1, %v832_v50  ;;  %v853_v60 = vadd.f32 %v1718_v56, %v1927_v34  ;;  %v716_v61 = vpop.f32.mrf.mxu0  ;;  %v844_v2 = vpop.f32.mrf.mxu1 }
 0x110   : > { %1268 = vst.msk [vmem:[%s1939_s29 + $0x60] sm:$0xf] %vm1243_vm1, %v1578_v52  ;;  %v1581_v62 = vpack.c.bf16 %v950_v53, %v950_v53  ;;  %v948_v63 = vmax.f32 %v704_v45, %v884_v54  ;;  %v889_v0 = vmul.f32 0.1, %v725_v55  ;;  %v717_v1 = vadd.f32 %v1927_v34, %v716_v61 }
 0x111   : > { %1300 = vst.msk [vmem:[%s1939_s29 + $0xe0] sm:$0xf] %vm1243_vm1, %v1610_v57  ;;  %v1613_v3 = vpack.c.bf16 %v982_v58, %v982_v58  ;;  %v980_v4 = vmax.f32 %v832_v50, %v916_v59  ;;  %v921_v5 = vmul.f32 0.1, %v853_v60  ;;  %v845_v6 = vadd.f32 %v1927_v34, %v844_v2  ;;  %v1687_v7 = vpop.f32.mrf.mxu0  ;;  %v1719_v12 = vpop.f32.mrf.mxu1 }
 0x112   : > { %1271 = vst.msk [vmem:[%s1939_s29 + $0x6c] sm:$0xf] %vm1243_vm1, %v1581_v62  ;;  %v1579_v8 = vpack.c.bf16 %v948_v63, %v948_v63  ;;  %v953_v9 = vmax.f32 %v725_v55, %v889_v0  ;;  %v887_v10 = vmul.f32 0.1, %v717_v1  ;;  %v728_v11 = vadd.f32 %v1687_v7, %v1927_v34 }
 0x113   : > { %1303 = vst.msk [vmem:[%s1939_s29 + $0xec] sm:$0xf] %vm1243_vm1, %v1613_v3  ;;  %v1611_v13 = vpack.c.bf16 %v980_v4, %v980_v4  ;;  %v985_v14 = vmax.f32 %v853_v60, %v921_v5  ;;  %v919_v15 = vmul.f32 0.1, %v845_v6  ;;  %v856_v16 = vadd.f32 %v1719_v12, %v1927_v34  ;;  %v719_v17 = vpop.f32.mrf.mxu0  ;;  %v847_v22 = vpop.f32.mrf.mxu1 }
 0x114   : > { %1269 = vst.msk [vmem:[%s1939_s29 + $0x64] sm:$0xf] %vm1243_vm1, %v1579_v8  ;;  %v1584_v18 = vpack.c.bf16 %v953_v9, %v953_v9  ;;  %v951_v19 = vmax.f32 %v717_v1, %v887_v10  ;;  %v890_v20 = vmul.f32 0.1, %v728_v11  ;;  %v720_v21 = vadd.f32 %v1927_v34, %v719_v17 }
 0x115   : > { %1301 = vst.msk [vmem:[%s1939_s29 + $0xe4] sm:$0xf] %vm1243_vm1, %v1611_v13  ;;  %v1616_v23 = vpack.c.bf16 %v985_v14, %v985_v14  ;;  %v983_v24 = vmax.f32 %v845_v6, %v919_v15  ;;  %v922_v25 = vmul.f32 0.1, %v856_v16  ;;  %v848_v26 = vadd.f32 %v1927_v34, %v847_v22 }
 0x116   : > { %1274 = vst.msk [vmem:[%s1939_s29 + $0x78] sm:$0xf] %vm1243_vm1, %v1584_v18  ;;  %v1582_v27 = vpack.c.bf16 %v951_v19, %v951_v19  ;;  %v954_v28 = vmax.f32 %v728_v11, %v890_v20  ;;  %v888_v29 = vmul.f32 0.1, %v720_v21 }
 0x117   : > { %1306 = vst.msk [vmem:[%s1939_s29 + $0xf8] sm:$0xf] %vm1243_vm1, %v1616_v23  ;;  %v1614_v30 = vpack.c.bf16 %v983_v24, %v983_v24  ;;  %v986_v31 = vmax.f32 %v856_v16, %v922_v25  ;;  %v920_v32 = vmul.f32 0.1, %v848_v26 }
 0x118   : > { %1272 = vst.msk [vmem:[%s1939_s29 + $0x70] sm:$0xf] %vm1243_vm1, %v1582_v27  ;;  %v1585_v33 = vpack.c.bf16 %v954_v28, %v954_v28  ;;  %v952_v35 = vmax.f32 %v720_v21, %v888_v29 }
 0x119   : > { %1304 = vst.msk [vmem:[%s1939_s29 + $0xf0] sm:$0xf] %vm1243_vm1, %v1614_v30  ;;  %v1617_v34 = vpack.c.bf16 %v986_v31, %v986_v31  ;;  %v984_v36 = vmax.f32 %v848_v26, %v920_v32 }
 0x11a   : > { %1275 = vst.msk [vmem:[%s1939_s29 + $0x7c] sm:$0xf] %vm1243_vm1, %v1585_v33  ;;  %v1583_v37 = vpack.c.bf16 %v952_v35, %v952_v35 }
 0x11b   : > { %1307 = vst.msk [vmem:[%s1939_s29 + $0xfc] sm:$0xf] %vm1243_vm1, %v1617_v34  ;;  %v1615_v38 = vpack.c.bf16 %v984_v36, %v984_v36 }
 0x11c   : > { %1273 = vst.msk [vmem:[%s1939_s29 + $0x74] sm:$0xf] %vm1243_vm1, %v1583_v37 }
 0x11d   : > { %1305 = vst.msk [vmem:[%s1939_s29 + $0xf4] sm:$0xf] %vm1243_vm1, %v1615_v38 }
 0x11e PF: > { %s13_s14 = sadd.s32 1, %s1804_s14   ;;  %s2141_s12 = smov %s1800_s13 }
 0x11f   : > { %p10_p5 = scmp.ge.s32.totalorder %s13_s14, 18   ;;  %s2142_s13 = smov %s2144_s15 }
 0x121   :  { %12 = sbr.rel (!%p10_p5) target bundleno = 2 (0x2), region = 68 }

</bundles_post_ra>
